<compile_context>
chip_gen: v5e
topology: v5e:2x2
jax: 0.10.0
libtpu: 0.0.40
codegen_flags: <defaults>
</compile_context>

<pallas_src>
import functools

import jax
import jax.numpy as jnp
from jax.experimental import pallas as pl
from jax.experimental.pallas import tpu as pltpu


def _round_up(x, m):
    return (x + m - 1) // m * m


def _cdiv(a, b):
    return -(-a // b)


def _ce_partial_kernel(*refs, num_streams, num_classes):
    """Accumulate per-lane (per-pixel) CE partial sums, one slice per stream."""
    logit_refs = refs[:num_streams]
    tgt_ref = refs[num_streams]                 # (1, tile_rows, 128) int32
    out_ref = refs[num_streams + 1]             # (1, S, tile_rows, 128) f32

    @pl.when(pl.program_id(2) == 0)
    def _():
        out_ref[...] = jnp.zeros_like(out_ref)

    tgt = tgt_ref[0]                            # (tile_rows, 128) int32
    valid = tgt >= 0                            # padded / ignored pixels are -1

    for s in range(num_streams):                # static, small (e.g. 2)
        x_ref = logit_refs[s]                   # block (1, C, tile_rows, 128)

        # Running class max — pure VPU, native dtype (bf16 VPU on v6e/v7x).
        m = x_ref[0, 0]
        for cc in range(1, num_classes):
            m = jnp.maximum(m, x_ref[0, cc])
        m = m.astype(jnp.float32)

        # Running sum(exp) + target-class logit select — pure VPU/EUP.
        sum_exp = jnp.zeros_like(m)
        tgt_logit = jnp.zeros_like(m)
        for cc in range(num_classes):
            xc = x_ref[0, cc].astype(jnp.float32)
            sum_exp = sum_exp + jnp.exp(xc - m)
            tgt_logit = jnp.where(tgt == cc, xc, tgt_logit)

        loss_px = jnp.log(sum_exp) + m - tgt_logit
        # Dense, unmasked accumulate into this stream's slice.
        out_ref[0, s] = out_ref[0, s] + jnp.where(valid, loss_px, 0.0)


def _choose_tiling(r_rows, num_streams, num_classes, itemsize):
    """Pick a pixel-row tile: MiB-scale blocks, VMEM-safe on v5e/v6e/v7x."""
    # HBM bytes streamed per 128-pixel row per grid step (all logits + tgt).
    bytes_per_row = num_streams * num_classes * 128 * itemsize + 128 * 4
    budget = 3 * 1024 * 1024          # per input block set (~6 MiB double-buffered)
    tile_rows = max(8, (budget // bytes_per_row) // 8 * 8)
    if tile_rows >= r_rows:
        tile_rows = r_rows            # full extent: always a legal block dim
        num_tiles = 1
    else:
        num_tiles = _cdiv(r_rows, tile_rows)
    # v7x megacore: a second parallel axis so both TensorCores get work even
    # when N == 1 (near-zero cost on single-TC v5e/v6e).
    t_outer = 2 if (num_tiles >= 2 and num_tiles % 2 == 0) else 1
    t_inner = num_tiles // t_outer
    return tile_rows, t_outer, t_inner


def multi_stream_ce_mean(multi_logits, targets, *, ignore_index=-100):
    """Per-stream mean softmax cross-entropy (nn.CrossEntropyLoss semantics)."""
    num_streams = len(multi_logits)
    n, c, h, w = multi_logits[0].shape
    dt = multi_logits[0].dtype
    for lg in multi_logits:
        assert lg.shape == (n, c, h, w), "streams must share the logits shape"
        assert lg.dtype == dt, "streams must share the logits dtype"
    hw = h * w
    hw128 = _round_up(hw, 128)
    r_rows = hw128 // 128

    tile_rows, t_outer, t_inner = _choose_tiling(r_rows, num_streams, c,
                                                 dt.itemsize)
    num_tiles = t_outer * t_inner
    r_pad = num_tiles * tile_rows     # grid coverage in 128-pixel rows

    # Free reshape NCHW -> (N, C, HW//128, 128).  Logits are only copied when
    # HW is not a multiple of 128 (typical seg resolutions need no copy).
    # TODO(synk): avoid this copy for HW % 128 != 0 via Element-indexed blocks.
    streams = []
    for lg in multi_logits:
        x = lg.reshape(n, c, hw)
        if hw128 != hw:
            x = jnp.pad(x, ((0, 0), (0, 0), (0, hw128 - hw)))
        streams.append(x.reshape(n, c, r_rows, 128))

    # Targets are 4 bytes/pixel: cheap to remap/pad to full grid coverage so
    # the validity mask is reliable even on ragged logits tail blocks.
    tgt = targets.reshape(n, hw).astype(jnp.int32)
    tgt = jnp.where(tgt == ignore_index, -1, tgt)
    tgt = jnp.pad(tgt, ((0, 0), (0, r_pad * 128 - hw)), constant_values=-1)
    tgt = tgt.reshape(n, r_pad, 128)

    grid = (n, t_outer, t_inner)
    logits_spec = pl.BlockSpec((1, c, tile_rows, 128),
                               lambda g, to, ti: (g, 0, to * t_inner + ti, 0))
    tgt_spec = pl.BlockSpec((1, tile_rows, 128),
                            lambda g, to, ti: (g, to * t_inner + ti, 0))
    out_spec = pl.BlockSpec((1, num_streams, tile_rows, 128),
                            lambda g, to, ti: (g * t_outer + to, 0, 0, 0))

    # Explicit VMEM budget: double-buffered inputs + resident output + temps.
    in_block = (num_streams * c * tile_rows * 128 * dt.itemsize
                + tile_rows * 128 * 4)
    out_block = num_streams * tile_rows * 128 * 4
    temps = 6 * tile_rows * 128 * 4
    vmem_limit = int(min(max(2 * in_block + 2 * out_block + temps + (2 << 20),
                             16 << 20), 48 << 20))

    partial = pl.pallas_call(
        functools.partial(_ce_partial_kernel,
                          num_streams=num_streams, num_classes=c),
        out_shape=jax.ShapeDtypeStruct(
            (n * t_outer, num_streams, tile_rows, 128), jnp.float32),
        grid_spec=pltpu.PrefetchScalarGridSpec(
            num_scalar_prefetch=0,
            grid=grid,
            in_specs=[logits_spec] * num_streams + [tgt_spec],
            out_specs=out_spec,
        ),
        compiler_params=pltpu.CompilerParams(
            dimension_semantics=("parallel", "parallel", "arbitrary"),
            vmem_limit_bytes=vmem_limit),
    )(*streams, tgt)

    # Tiny final cross-lane reduction + mean in plain JAX.
    per_stream = jnp.sum(partial, axis=(0, 2, 3))              # (S,)
    n_valid = jnp.maximum(jnp.sum((tgt >= 0).astype(jnp.float32)), 1.0)
    return per_stream / n_valid


def multi_stream_loss(multi_logits, targets, loss_weights, *,
                      ignore_index=-100):
    """JAX/Pallas equivalent of MultiStreamLoss.forward with CE loss_fn."""
    w = jnp.asarray(loss_weights, dtype=jnp.float32)
    per_stream = multi_stream_ce_mean(multi_logits, targets,
                                      ignore_index=ignore_index)   # (S,)
    weighted = per_stream * w
    total = jnp.sum(weighted)
    losses = [jax.lax.stop_gradient(weighted[i])                   # mirrors .detach()
              for i in range(len(multi_logits))]
    return {"loss": total, "losses": losses}


if __name__ == "__main__":
    key = jax.random.PRNGKey(0)
    k1, k2, k3 = jax.random.split(key, 3)

    N, C, H, W = 2, 4, 16, 16
    logits_a = jax.random.normal(k1, (N, C, H, W), dtype=jnp.float32)
    logits_b = jax.random.normal(k2, (N, C, H, W), dtype=jnp.float32)
    targets = jax.random.randint(k3, (N, H, W), 0, C, dtype=jnp.int32)

    loss_weights = [1.0, 0.4]

    out = multi_stream_loss([logits_a, logits_b], targets, loss_weights)
    jax.block_until_ready(out["loss"])

    # Reference check in plain JAX (mean CE over all pixels, no ignore labels).
    def ref_ce(logits, tgt):
        x = jnp.transpose(logits, (0, 2, 3, 1)).reshape(-1, logits.shape[1])
        t = tgt.reshape(-1)
        logz = jax.scipy.special.logsumexp(x, axis=-1)
        return jnp.mean(logz - x[jnp.arange(x.shape[0]), t])

    ref = (ref_ce(logits_a, targets) * loss_weights[0]
           + ref_ce(logits_b, targets) * loss_weights[1])
    assert jnp.allclose(out["loss"], ref, atol=1e-5, rtol=1e-5), (out["loss"], ref)

    print("KERNEL_OK")
</pallas_src>

<mosaic_0001>
module attributes {stable_mosaic.version = 11 : i64} {
  func.func @_ce_partial_kernel(%arg0: i32, %arg1: i32, %arg2: i32, %arg3: memref<1x4x2x128xf32, #tpu.memory_space<vmem>>, %arg4: memref<1x4x2x128xf32, #tpu.memory_space<vmem>>, %arg5: memref<1x2x128xi32, #tpu.memory_space<vmem>>, %arg6: memref<1x2x2x128xf32, #tpu.memory_space<vmem>>) attributes {dimension_semantics = [#tpu.dimension_semantics<parallel>, #tpu.dimension_semantics<parallel>, #tpu.dimension_semantics<arbitrary>], iteration_bounds = array<i64: 2, 1, 1>, scalar_prefetch = 0 : i64, scratch_operands = 0 : i64, tpu.core_type = #tpu.core_type<tc>, window_params = [{transform_indices = @transform_0, window_bounds = array<i64: 1, 4, 2, 128>}, {transform_indices = @transform_1, window_bounds = array<i64: 1, 4, 2, 128>}, {transform_indices = @transform_2, window_bounds = array<i64: 1, 2, 128>}, {transform_indices = @transform_3, window_bounds = array<i64: 1, 2, 2, 128>}]} {
    %c0_i32 = arith.constant 0 : i32
    %0 = arith.cmpi eq, %arg2, %c0_i32 : i32
    %1 = arith.extui %0 : i1 to i32
    %c0_i32_0 = arith.constant 0 : i32
    %2 = arith.cmpi ne, %1, %c0_i32_0 : i32
    scf.if %2 {
      %cst_91 = arith.constant 0.000000e+00 : f32
      %119 = vector.broadcast %cst_91 : f32 to vector<1x2x2x128xf32>
      %c0_92 = arith.constant 0 : index
      %c0_93 = arith.constant 0 : index
      %c0_94 = arith.constant 0 : index
      %c0_95 = arith.constant 0 : index
      %120 = vector.load %arg6[%c0_92, %c0_93, %c0_94, %c0_95] : memref<1x2x2x128xf32, #tpu.memory_space<vmem>>, vector<1x2x2x128xf32>
      tpu.vector_store %arg6[%c0_92, %c0_93, %c0_94, %c0_95], %119 {strides = array<i32>} : memref<1x2x2x128xf32, #tpu.memory_space<vmem>>, vector<1x2x2x128xf32>,
    } else {
    }
    %c0 = arith.constant 0 : index
    %c0_1 = arith.constant 0 : index
    %c0_2 = arith.constant 0 : index
    %3 = vector.load %arg5[%c0, %c0_1, %c0_2] : memref<1x2x128xi32, #tpu.memory_space<vmem>>, vector<1x2x128xi32>
    %4 = vector.shape_cast %3 : vector<1x2x128xi32> to vector<2x128xi32>
    %c0_i32_3 = arith.constant 0 : i32
    %5 = vector.broadcast %c0_i32_3 : i32 to vector<2x128xi32>
    %6 = arith.cmpi sge, %4, %5 : vector<2x128xi32>
    %c0_4 = arith.constant 0 : index
    %c0_5 = arith.constant 0 : index
    %c0_6 = arith.constant 0 : index
    %c0_7 = arith.constant 0 : index
    %7 = vector.load %arg3[%c0_4, %c0_5, %c0_6, %c0_7] : memref<1x4x2x128xf32, #tpu.memory_space<vmem>>, vector<1x1x2x128xf32>
    %8 = vector.shape_cast %7 : vector<1x1x2x128xf32> to vector<2x128xf32>
    %c0_8 = arith.constant 0 : index
    %c1 = arith.constant 1 : index
    %c0_9 = arith.constant 0 : index
    %c0_10 = arith.constant 0 : index
    %9 = vector.load %arg3[%c0_8, %c1, %c0_9, %c0_10] : memref<1x4x2x128xf32, #tpu.memory_space<vmem>>, vector<1x1x2x128xf32>
    %10 = vector.shape_cast %9 : vector<1x1x2x128xf32> to vector<2x128xf32>
    %11 = arith.maximumf %8, %10 : vector<2x128xf32>
    %c0_11 = arith.constant 0 : index
    %c2 = arith.constant 2 : index
    %c0_12 = arith.constant 0 : index
    %c0_13 = arith.constant 0 : index
    %12 = vector.load %arg3[%c0_11, %c2, %c0_12, %c0_13] : memref<1x4x2x128xf32, #tpu.memory_space<vmem>>, vector<1x1x2x128xf32>
    %13 = vector.shape_cast %12 : vector<1x1x2x128xf32> to vector<2x128xf32>
    %14 = arith.maximumf %11, %13 : vector<2x128xf32>
    %c0_14 = arith.constant 0 : index
    %c3 = arith.constant 3 : index
    %c0_15 = arith.constant 0 : index
    %c0_16 = arith.constant 0 : index
    %15 = vector.load %arg3[%c0_14, %c3, %c0_15, %c0_16] : memref<1x4x2x128xf32, #tpu.memory_space<vmem>>, vector<1x1x2x128xf32>
    %16 = vector.shape_cast %15 : vector<1x1x2x128xf32> to vector<2x128xf32>
    %17 = arith.maximumf %14, %16 : vector<2x128xf32>
    %cst = arith.constant 0.000000e+00 : f32
    %18 = vector.broadcast %cst : f32 to vector<2x128xf32>
    %cst_17 = arith.constant 0.000000e+00 : f32
    %19 = vector.broadcast %cst_17 : f32 to vector<2x128xf32>
    %c0_18 = arith.constant 0 : index
    %c0_19 = arith.constant 0 : index
    %c0_20 = arith.constant 0 : index
    %c0_21 = arith.constant 0 : index
    %20 = vector.load %arg3[%c0_18, %c0_19, %c0_20, %c0_21] : memref<1x4x2x128xf32, #tpu.memory_space<vmem>>, vector<1x1x2x128xf32>
    %21 = vector.shape_cast %20 : vector<1x1x2x128xf32> to vector<2x128xf32>
    %22 = arith.subf %21, %17 : vector<2x128xf32>
    %23 = math.exp %22 : vector<2x128xf32>
    %24 = arith.addf %18, %23 : vector<2x128xf32>
    %c0_i32_22 = arith.constant 0 : i32
    %25 = vector.broadcast %c0_i32_22 : i32 to vector<2x128xi32>
    %26 = arith.cmpi eq, %4, %25 : vector<2x128xi32>
    %27 = arith.select %26, %21, %19 : vector<2x128xi1>, vector<2x128xf32>
    %c0_23 = arith.constant 0 : index
    %c1_24 = arith.constant 1 : index
    %c0_25 = arith.constant 0 : index
    %c0_26 = arith.constant 0 : index
    %28 = vector.load %arg3[%c0_23, %c1_24, %c0_25, %c0_26] : memref<1x4x2x128xf32, #tpu.memory_space<vmem>>, vector<1x1x2x128xf32>
    %29 = vector.shape_cast %28 : vector<1x1x2x128xf32> to vector<2x128xf32>
    %30 = arith.subf %29, %17 : vector<2x128xf32>
    %31 = math.exp %30 : vector<2x128xf32>
    %32 = arith.addf %24, %31 : vector<2x128xf32>
    %c1_i32 = arith.constant 1 : i32
    %33 = vector.broadcast %c1_i32 : i32 to vector<2x128xi32>
    %34 = arith.cmpi eq, %4, %33 : vector<2x128xi32>
    %35 = arith.select %34, %29, %27 : vector<2x128xi1>, vector<2x128xf32>
    %c0_27 = arith.constant 0 : index
    %c2_28 = arith.constant 2 : index
    %c0_29 = arith.constant 0 : index
    %c0_30 = arith.constant 0 : index
    %36 = vector.load %arg3[%c0_27, %c2_28, %c0_29, %c0_30] : memref<1x4x2x128xf32, #tpu.memory_space<vmem>>, vector<1x1x2x128xf32>
    %37 = vector.shape_cast %36 : vector<1x1x2x128xf32> to vector<2x128xf32>
    %38 = arith.subf %37, %17 : vector<2x128xf32>
    %39 = math.exp %38 : vector<2x128xf32>
    %40 = arith.addf %32, %39 : vector<2x128xf32>
    %c2_i32 = arith.constant 2 : i32
    %41 = vector.broadcast %c2_i32 : i32 to vector<2x128xi32>
    %42 = arith.cmpi eq, %4, %41 : vector<2x128xi32>
    %43 = arith.select %42, %37, %35 : vector<2x128xi1>, vector<2x128xf32>
    %c0_31 = arith.constant 0 : index
    %c3_32 = arith.constant 3 : index
    %c0_33 = arith.constant 0 : index
    %c0_34 = arith.constant 0 : index
    %44 = vector.load %arg3[%c0_31, %c3_32, %c0_33, %c0_34] : memref<1x4x2x128xf32, #tpu.memory_space<vmem>>, vector<1x1x2x128xf32>
    %45 = vector.shape_cast %44 : vector<1x1x2x128xf32> to vector<2x128xf32>
    %46 = arith.subf %45, %17 : vector<2x128xf32>
    %47 = math.exp %46 : vector<2x128xf32>
    %48 = arith.addf %40, %47 : vector<2x128xf32>
    %c3_i32 = arith.constant 3 : i32
    %49 = vector.broadcast %c3_i32 : i32 to vector<2x128xi32>
    %50 = arith.cmpi eq, %4, %49 : vector<2x128xi32>
    %51 = arith.select %50, %45, %43 : vector<2x128xi1>, vector<2x128xf32>
    %52 = math.log %48 : vector<2x128xf32>
    %53 = arith.addf %52, %17 : vector<2x128xf32>
    %54 = arith.subf %53, %51 : vector<2x128xf32>
    %c0_35 = arith.constant 0 : index
    %c0_36 = arith.constant 0 : index
    %c0_37 = arith.constant 0 : index
    %c0_38 = arith.constant 0 : index
    %55 = vector.load %arg6[%c0_35, %c0_36, %c0_37, %c0_38] : memref<1x2x2x128xf32, #tpu.memory_space<vmem>>, vector<1x1x2x128xf32>
    %56 = vector.shape_cast %55 : vector<1x1x2x128xf32> to vector<2x128xf32>
    %cst_39 = arith.constant 0.000000e+00 : f32
    %57 = vector.broadcast %cst_39 : f32 to vector<2x128xf32>
    %58 = arith.select %6, %54, %57 : vector<2x128xi1>, vector<2x128xf32>
    %59 = arith.addf %56, %58 : vector<2x128xf32>
    %c0_40 = arith.constant 0 : index
    %c0_41 = arith.constant 0 : index
    %c0_42 = arith.constant 0 : index
    %c0_43 = arith.constant 0 : index
    %60 = vector.load %arg6[%c0_40, %c0_41, %c0_42, %c0_43] : memref<1x2x2x128xf32, #tpu.memory_space<vmem>>, vector<1x1x2x128xf32>
    %61 = vector.shape_cast %60 : vector<1x1x2x128xf32> to vector<2x128xf32>
    %62 = vector.shape_cast %59 : vector<2x128xf32> to vector<1x1x2x128xf32>
    tpu.vector_store %arg6[%c0_40, %c0_41, %c0_42, %c0_43], %62 {strides = array<i32>} : memref<1x2x2x128xf32, #tpu.memory_space<vmem>>, vector<1x1x2x128xf32>,
    %c0_44 = arith.constant 0 : index
    %c0_45 = arith.constant 0 : index
    %c0_46 = arith.constant 0 : index
    %c0_47 = arith.constant 0 : index
    %63 = vector.load %arg4[%c0_44, %c0_45, %c0_46, %c0_47] : memref<1x4x2x128xf32, #tpu.memory_space<vmem>>, vector<1x1x2x128xf32>
    %64 = vector.shape_cast %63 : vector<1x1x2x128xf32> to vector<2x128xf32>
    %c0_48 = arith.constant 0 : index
    %c1_49 = arith.constant 1 : index
    %c0_50 = arith.constant 0 : index
    %c0_51 = arith.constant 0 : index
    %65 = vector.load %arg4[%c0_48, %c1_49, %c0_50, %c0_51] : memref<1x4x2x128xf32, #tpu.memory_space<vmem>>, vector<1x1x2x128xf32>
    %66 = vector.shape_cast %65 : vector<1x1x2x128xf32> to vector<2x128xf32>
    %67 = arith.maximumf %64, %66 : vector<2x128xf32>
    %c0_52 = arith.constant 0 : index
    %c2_53 = arith.constant 2 : index
    %c0_54 = arith.constant 0 : index
    %c0_55 = arith.constant 0 : index
    %68 = vector.load %arg4[%c0_52, %c2_53, %c0_54, %c0_55] : memref<1x4x2x128xf32, #tpu.memory_space<vmem>>, vector<1x1x2x128xf32>
    %69 = vector.shape_cast %68 : vector<1x1x2x128xf32> to vector<2x128xf32>
    %70 = arith.maximumf %67, %69 : vector<2x128xf32>
    %c0_56 = arith.constant 0 : index
    %c3_57 = arith.constant 3 : index
    %c0_58 = arith.constant 0 : index
    %c0_59 = arith.constant 0 : index
    %71 = vector.load %arg4[%c0_56, %c3_57, %c0_58, %c0_59] : memref<1x4x2x128xf32, #tpu.memory_space<vmem>>, vector<1x1x2x128xf32>
    %72 = vector.shape_cast %71 : vector<1x1x2x128xf32> to vector<2x128xf32>
    %73 = arith.maximumf %70, %72 : vector<2x128xf32>
    %cst_60 = arith.constant 0.000000e+00 : f32
    %74 = vector.broadcast %cst_60 : f32 to vector<2x128xf32>
    %cst_61 = arith.constant 0.000000e+00 : f32
    %75 = vector.broadcast %cst_61 : f32 to vector<2x128xf32>
    %c0_62 = arith.constant 0 : index
    %c0_63 = arith.constant 0 : index
    %c0_64 = arith.constant 0 : index
    %c0_65 = arith.constant 0 : index
    %76 = vector.load %arg4[%c0_62, %c0_63, %c0_64, %c0_65] : memref<1x4x2x128xf32, #tpu.memory_space<vmem>>, vector<1x1x2x128xf32>
    %77 = vector.shape_cast %76 : vector<1x1x2x128xf32> to vector<2x128xf32>
    %78 = arith.subf %77, %73 : vector<2x128xf32>
    %79 = math.exp %78 : vector<2x128xf32>
    %80 = arith.addf %74, %79 : vector<2x128xf32>
    %c0_i32_66 = arith.constant 0 : i32
    %81 = vector.broadcast %c0_i32_66 : i32 to vector<2x128xi32>
    %82 = arith.cmpi eq, %4, %81 : vector<2x128xi32>
    %83 = arith.select %82, %77, %75 : vector<2x128xi1>, vector<2x128xf32>
    %c0_67 = arith.constant 0 : index
    %c1_68 = arith.constant 1 : index
    %c0_69 = arith.constant 0 : index
    %c0_70 = arith.constant 0 : index
    %84 = vector.load %arg4[%c0_67, %c1_68, %c0_69, %c0_70] : memref<1x4x2x128xf32, #tpu.memory_space<vmem>>, vector<1x1x2x128xf32>
    %85 = vector.shape_cast %84 : vector<1x1x2x128xf32> to vector<2x128xf32>
    %86 = arith.subf %85, %73 : vector<2x128xf32>
    %87 = math.exp %86 : vector<2x128xf32>
    %88 = arith.addf %80, %87 : vector<2x128xf32>
    %c1_i32_71 = arith.constant 1 : i32
    %89 = vector.broadcast %c1_i32_71 : i32 to vector<2x128xi32>
    %90 = arith.cmpi eq, %4, %89 : vector<2x128xi32>
    %91 = arith.select %90, %85, %83 : vector<2x128xi1>, vector<2x128xf32>
    %c0_72 = arith.constant 0 : index
    %c2_73 = arith.constant 2 : index
    %c0_74 = arith.constant 0 : index
    %c0_75 = arith.constant 0 : index
    %92 = vector.load %arg4[%c0_72, %c2_73, %c0_74, %c0_75] : memref<1x4x2x128xf32, #tpu.memory_space<vmem>>, vector<1x1x2x128xf32>
    %93 = vector.shape_cast %92 : vector<1x1x2x128xf32> to vector<2x128xf32>
    %94 = arith.subf %93, %73 : vector<2x128xf32>
    %95 = math.exp %94 : vector<2x128xf32>
    %96 = arith.addf %88, %95 : vector<2x128xf32>
    %c2_i32_76 = arith.constant 2 : i32
    %97 = vector.broadcast %c2_i32_76 : i32 to vector<2x128xi32>
    %98 = arith.cmpi eq, %4, %97 : vector<2x128xi32>
    %99 = arith.select %98, %93, %91 : vector<2x128xi1>, vector<2x128xf32>
    %c0_77 = arith.constant 0 : index
    %c3_78 = arith.constant 3 : index
    %c0_79 = arith.constant 0 : index
    %c0_80 = arith.constant 0 : index
    %100 = vector.load %arg4[%c0_77, %c3_78, %c0_79, %c0_80] : memref<1x4x2x128xf32, #tpu.memory_space<vmem>>, vector<1x1x2x128xf32>
    %101 = vector.shape_cast %100 : vector<1x1x2x128xf32> to vector<2x128xf32>
    %102 = arith.subf %101, %73 : vector<2x128xf32>
    %103 = math.exp %102 : vector<2x128xf32>
    %104 = arith.addf %96, %103 : vector<2x128xf32>
    %c3_i32_81 = arith.constant 3 : i32
    %105 = vector.broadcast %c3_i32_81 : i32 to vector<2x128xi32>
    %106 = arith.cmpi eq, %4, %105 : vector<2x128xi32>
    %107 = arith.select %106, %101, %99 : vector<2x128xi1>, vector<2x128xf32>
    %108 = math.log %104 : vector<2x128xf32>
    %109 = arith.addf %108, %73 : vector<2x128xf32>
    %110 = arith.subf %109, %107 : vector<2x128xf32>
    %c0_82 = arith.constant 0 : index
    %c1_83 = arith.constant 1 : index
    %c0_84 = arith.constant 0 : index
    %c0_85 = arith.constant 0 : index
    %111 = vector.load %arg6[%c0_82, %c1_83, %c0_84, %c0_85] : memref<1x2x2x128xf32, #tpu.memory_space<vmem>>, vector<1x1x2x128xf32>
    %112 = vector.shape_cast %111 : vector<1x1x2x128xf32> to vector<2x128xf32>
    %cst_86 = arith.constant 0.000000e+00 : f32
    %113 = vector.broadcast %cst_86 : f32 to vector<2x128xf32>
    %114 = arith.select %6, %110, %113 : vector<2x128xi1>, vector<2x128xf32>
    %115 = arith.addf %112, %114 : vector<2x128xf32>
    %c0_87 = arith.constant 0 : index
    %c1_88 = arith.constant 1 : index
    %c0_89 = arith.constant 0 : index
    %c0_90 = arith.constant 0 : index
    %116 = vector.load %arg6[%c0_87, %c1_88, %c0_89, %c0_90] : memref<1x2x2x128xf32, #tpu.memory_space<vmem>>, vector<1x1x2x128xf32>
    %117 = vector.shape_cast %116 : vector<1x1x2x128xf32> to vector<2x128xf32>
    %118 = vector.shape_cast %115 : vector<2x128xf32> to vector<1x1x2x128xf32>
    tpu.vector_store %arg6[%c0_87, %c1_88, %c0_89, %c0_90], %118 {strides = array<i32>} : memref<1x2x2x128xf32, #tpu.memory_space<vmem>>, vector<1x1x2x128xf32>,
    return
  }
  func.func @transform_0(%arg0: i32, %arg1: i32, %arg2: i32) -> (i32, i32, i32, i32) {
    %c1_i32 = arith.constant 1 : i32
    %0 = arith.muli %arg1, %c1_i32 : i32
    %1 = arith.addi %0, %arg2 : i32
    %c0_i32 = arith.constant 0 : i32
    %c0_i32_0 = arith.constant 0 : i32
    %c0_i32_1 = arith.constant 0 : i32
    return %arg0, %c0_i32, %1, %c0_i32_0 : i32, i32, i32, i32
  }
  func.func @transform_1(%arg0: i32, %arg1: i32, %arg2: i32) -> (i32, i32, i32, i32) {
    %c1_i32 = arith.constant 1 : i32
    %0 = arith.muli %arg1, %c1_i32 : i32
    %1 = arith.addi %0, %arg2 : i32
    %c0_i32 = arith.constant 0 : i32
    %c0_i32_0 = arith.constant 0 : i32
    %c0_i32_1 = arith.constant 0 : i32
    return %arg0, %c0_i32, %1, %c0_i32_0 : i32, i32, i32, i32
  }
  func.func @transform_2(%arg0: i32, %arg1: i32, %arg2: i32) -> (i32, i32, i32) {
    %c1_i32 = arith.constant 1 : i32
    %0 = arith.muli %arg1, %c1_i32 : i32
    %1 = arith.addi %0, %arg2 : i32
    %c0_i32 = arith.constant 0 : i32
    %c0_i32_0 = arith.constant 0 : i32
    return %arg0, %1, %c0_i32 : i32, i32, i32
  }
  func.func @transform_3(%arg0: i32, %arg1: i32, %arg2: i32) -> (i32, i32, i32, i32) {
    %c1_i32 = arith.constant 1 : i32
    %0 = arith.muli %arg0, %c1_i32 : i32
    %1 = arith.addi %0, %arg1 : i32
    %c0_i32 = arith.constant 0 : i32
    %c0_i32_0 = arith.constant 0 : i32
    %c0_i32_1 = arith.constant 0 : i32
    %c0_i32_2 = arith.constant 0 : i32
    return %1, %c0_i32, %c0_i32_0, %c0_i32_1 : i32, i32, i32, i32
  }
}

</mosaic_0001>

<bundles_post_ra>
// kernel: tpu_custom_call.1
= control target key start
LH: loop header
LB: loop body
LE: loop exit
PB: predicated region body
PF: predicated region fallthrough
CT: control target
= control target key end

     0   :  { %s1078_s0 = inlined_call_operand.hbm [shape: f32[2,4,2,128], index: 0, kind: input, shape index: {}]   ;;  %s1079_s1 = inlined_call_operand.hbm [shape: f32[2,4,2,128], index: 1, kind: input, shape index: {}]   ;;  %s1080_s2 = inlined_call_operand.hbm [shape: s32[2,2,128], index: 2, kind: input, shape index: {}]   ;;  %s1081_s3 = inlined_call_operand.hbm [shape: f32[2,2,2,128], index: 3, kind: output, shape index: {}]  }
   0x1   :  { %1090 = sst [smem:[#allocation19_spill]] %s1079_s1 }
   0x2   :  { %8 = vsyncpa [#allocation3], 0 }
   0x3   :  { %10 = vsyncpa [#allocation3 + $0x1], 0 }
   0x4   :  { %11 = vsyncpa [#allocation6], 0 }
   0x5   :  { %13 = vsyncpa [#allocation6 + $0x1], 0 }
   0x6   :  { %14 = vsyncpa [#allocation4], 0 }
   0x7   :  { %16 = vsyncpa [#allocation4 + $0x1], 0  ;;  %s887_s12 = smov 0   ;;  %s889_s13 = smov 0  }
   0x8   :  { %s891_s14 = smov 0   ;;  %s893_s15 = smov 0  }
   0x9   :  { %s895_s16 = smov 0   ;;  %s897_s17 = smov 0  }
   0xa LB: > { %1091 = sst [smem:[#allocation12_spill]] %s840_s12  ;;  %s918_s18 = sadd.s32 4294967295, %s860_s17   ;;  %s860_s17 = sphi %s897_s17, %s22_s17   ;;  %s856_s16 = sphi %s895_s16, %s1115_s16   ;;  %s852_s15 = sphi %s893_s15, %s1114_s15   ;;  %s848_s14 = sphi %s891_s14, %s1110_s14   ;;  %s844_s13 = sphi %s889_s13, %s1113_s13   ;;  %s840_s12 = sphi %s887_s12, %s1112_s12  }
   0xb   : > { %1092 = sst [smem:[#allocation13_spill]] %s848_s14  ;;  %s555_s19 = sadd.s32 4294967294, %s860_s17  }
   0xc   : > { %1093 = sst [smem:[#allocation14_spill]] %s860_s17  ;;  %s41_s20 = sadd.s32 1, %s856_s16 }
   0xd   : > { %s52_s21 = sadd.s32 1, %s848_s14  ;;  %p43_p0 = scmp.ge.s32.totalorder %s41_s20, 2 }
   0xe   : > { %p59_p1 = scmp.ne.s32.totalorder %s848_s14, %s844_s13  ;;  %p60_p2 = scmp.eq.s32.totalorder %s860_s17, 0 }
   0xf   : > { %p65_p3 = scmp.ne.s32.totalorder %s844_s13, %s840_s12  ;;  %s1117_s20 = smov (%p43_p0, %s41_s20), 0 }
  0x10   : > { %1094 = sst [smem:[#allocation15_spill]] %s1117_s20  ;;  %p930_p4 = por %p60_p2, %p59_p1 }
  0x11   : > { %p66_p5 = scmp.eq.s32.totalorder %s918_s18, 0  ;;  %s47_s23 = ssub.s32 %s856_s16, %s1117_s20 }
  0x12   : > { %p151_p6 = scmp.eq.s32.totalorder %s918_s18, 1  ;;  %p50_p7 = scmp.eq.s32.totalorder %s47_s23, 0 }
  0x13   : > { %p938_p8 = por %p66_p5, %p65_p3  ;;  %p157_p10 = scmp.eq.s32.totalorder %s555_s19, 1 }
  0x14   : > { %p942_p9 = por %p151_p6, %p59_p1  ;;  %p557_p12 = scmp.ge.s32.totalorder %s860_s17, 2 }
  0x15   : > { %s947_s26 = scalar_select %p50_p7, %s848_s14, %s52_s21  }
  0x16   : > { %s1097_s25 = scalar_select %p942_p9, 1, 0 }
  0x17   : > { %1099 = sst [smem:[#allocation17_spill]] %s947_s26  ;;  %p949_p11 = por %p157_p10, %p65_p3 }
  0x18   : > { %1098 = sst [smem:[#allocation16_spill]] %s1097_s25  ;;  %p609_p13 = scmp.lt.s32.totalorder %s860_s17, 2 }
  0x19   : > { %s1100_s27 = scalar_select %p949_p11, 1, 0 }
  0x1a   : > { %s956_s28 = sand.u32 1, %s848_s14   ;;  %s584_s30 = sshll.u32 %s856_s16, 3 }
  0x1b   : > { %1101 = sst [smem:[#allocation18_spill]] %s1100_s27  ;;  %s558_s29 = sshll.u32 %s956_s28, 3 }
  0x1c   : > { %p962_p0 = pnand %p609_p13, %p930_p4  ;;  %s201_s5 = sand.u32 1, %s860_s17  }
  0x1d   : > { %s1103_s1 = sld [smem:[#allocation19_spill]]  ;;  %s205_s10 = scalar_lea.vmem [#allocation5], %s558_s29 }
  0x1e   : > { %s215_s11 = sshll.u32 %s205_s10, 4  ;;  %s202_s19 = scalar_lea.sflag [#allocation6], %s201_s5  ;;  %s216_s11 = int_to_ptr.vmem [resolvable:$true] %s215_s11 }
  0x1f   : > { %s862_s21 = smov 32   ;;  %s863_s22 = smov 2  }
  0x20   : > { %p566_p1 = scmp.ge.s32.totalorder %s860_s17, 1  ;;  %p244_p2 = scmp.lt.s32.totalorder %s860_s17, 3 }
  0x21   : > { %s178_s5 = scalar_lea.sflag [#allocation3], %s956_s28 }
  0x22   : > { %p974_p3 = pnand %p566_p1, %p244_p2 }
  0x23   : > { %s212_s8 = scalar_lea.hbm %s1103_s1, %s584_s30  ;;  %s181_s1 = scalar_lea.vmem [#allocation2], %s558_s29 }
  0x24   : > { %s213_s9 = sshll.u32 %s212_s8, 4  ;;  %s188_s8 = scalar_lea.hbm %s1078_s0, %s584_s30  ;;  %s214_s9 = int_to_ptr.hbm [resolvable:$true] %s213_s9 }
  0x25   : > { %601 = dma.hbm_to_vmem [thread:$0]  (!%p962_p0), %s214_s9, 128, %s216_s11, %s202_s19, %s862_s21, %s862_s21, %s863_s22  }
  0x26   : > { %s189_s10 = sshll.u32 %s188_s8, 4  ;;  %s191_s20 = sshll.u32 %s181_s1, 4  ;;  %s190_s10 = int_to_ptr.hbm [resolvable:$true] %s189_s10  ;;  %s192_s20 = int_to_ptr.vmem [resolvable:$true] %s191_s20 }
  0x27   : > { %598 = dma.hbm_to_vmem [thread:$0]  (!%p962_p0), %s190_s10, 128, %s192_s20, %s178_s5, %s862_s21, %s862_s21, %s863_s22  }
  0x28   : > { %s564_s9 = sshll.u32 %s956_s28, 1  ;;  %s565_s11 = sshll.u32 %s856_s16, 1 }
  0x29   : > { %s235_s17 = scalar_lea.hbm %s1080_s2, %s565_s11  ;;  %s229_s12 = scalar_lea.vmem [#allocation7], %s564_s9 }
  0x2a   : > { %s237_s27 = sshll.u32 %s235_s17, 4  ;;  %s239_s25 = sshll.u32 %s229_s12, 4  ;;  %s238_s27 = int_to_ptr.hbm [resolvable:$true] %s237_s27  ;;  %s240_s25 = int_to_ptr.vmem [resolvable:$true] %s239_s25 }
  0x2b   : > { %604 = dma.hbm_to_vmem [thread:$0]  (!%p962_p0), %s238_s27, 32, %s240_s25, %s202_s19  }
  0x2c   : > { %248 = sbr.rel (%p974_p3) target bundleno = 103 (0x67), region = 32  ;;  %s994_s1 = sand.u32 (!%p974_p3), 1, %s844_s13  }
  0x2d   : > { %s567_s20 = sshll.u32 (!%p974_p3), %s994_s1, 3  ;;  %s251_s28 = scalar_lea.sflag (!%p974_p3), [#allocation3], %s994_s1 }
  0x2e   : > { %s254_s14 = scalar_lea.vmem (!%p974_p3), [#allocation2], %s567_s20 }
  0x31   : > { %827 = dma.done.wait (%p938_p8), %s251_s28, 128  }
  0x32   : > { %829 = vsyncadd (%p938_p8), %s251_s28, 4294967168  ;;  %s260_s12 = sand.u32 1, %s918_s18   ;;  %s264_s25 = scalar_lea.vmem [#allocation5], %s567_s20 }
  0x33   : > { %s261_s17 = scalar_lea.sflag [#allocation6], %s260_s12 }
  0x34   : > { %831 = dma.done.wait (%p938_p8), %s261_s17, 160  }
  0x35   : > { %833 = vsyncadd (%p938_p8), %s261_s17, 4294967136  ;;  %s570_s26 = sshll.u32 %s994_s1, 2  ;;  %v864_v0 = vmov 0.0   ;;  %v320_v1 = vld [vmem:[%s254_s14] sm:$0x3]  ;;  %s569_s18 = sshll.u32 %s994_s1, 1 }
  0x36   : > { %s1008_s27 = scalar_lea.vmem [#allocation8], %s570_s26  ;;  %v571_v2 = vld [vmem:[%s254_s14 + $0x2] sm:$0x3]  ;;  %v572_v4 = vld [vmem:[%s254_s14 + $0x4] sm:$0x3]  ;;  %s274_s24 = scalar_lea.vmem [#allocation7], %s569_s18 }
  0x37   : > { %316 = vst [vmem:[%s1008_s27] sm:$0x3] %v864_v0  ;;  %v323_v3 = vmax.f32 %v320_v1, %v571_v2  ;;  %v1012_v5 = vld [vmem:[%s254_s14 + $0x6] sm:$0x3]  ;;  %v362_v6 = vld [vmem:[%s264_s25] sm:$0x3]  ;;  %s586_s29 = sshll.u32 %s852_s15, 2 }
  0x38   : > { %317 = vst [vmem:[%s1008_s27 + $0x2] sm:$0x3] %v864_v0  ;;  %v574_v8 = vld [vmem:[%s264_s25 + $0x2] sm:$0x3]  ;;  %v1014_v9 = vld [vmem:[%s264_s25 + $0x4] sm:$0x3]  ;;  %s414_s19 = scalar_lea.hbm %s1081_s3, %s586_s29 }
  0x39   : > { %v326_v7 = vmax.f32 %v323_v3, %v572_v4  ;;  %v365_v10 = vmax.f32 %v362_v6, %v574_v8  ;;  %v1017_v12 = vld [vmem:[%s264_s25 + $0x6] sm:$0x3]  ;;  %v318_v33 = vld [vmem:[%s274_s24] sm:$0x3]  ;;  %s415_s21 = sshll.u32 %s1008_s27, 4  ;;  %s417_s22 = sshll.u32 %s414_s19, 4  ;;  %s416_s21 = int_to_ptr.vmem [resolvable:$true] %s415_s21  ;;  %s418_s22 = int_to_ptr.hbm [resolvable:$true] %s417_s22 }
  0x3a   : > { %vm334_vm0 = vcmp.eq.s32.totalorder %v318_v33, 0  ;;  %vm340_vm1 = vcmp.eq.s32.totalorder %v318_v33, 1  ;;  %vm346_vm2 = vcmp.eq.s32.totalorder %v318_v33, 2  ;;  %vm352_vm3 = vcmp.eq.s32.totalorder %v318_v33, 3  ;;  %s402_s23 = scalar_lea.sflag [#allocation4], %s994_s1  ;;  %s788_s6 = sshra.s32 %s418_s22, 4  ;;  %s789_s6 = int_to_ptr.hbm [resolvable:$true] %s788_s6 }
  0x3b   : > { %v329_v11 = vmax.f32 %v326_v7, %v1012_v5  ;;  %v368_v13 = vmax.f32 %v365_v10, %v1014_v9  ;;  %v335_v44 = vsel %vm334_vm0, %v320_v1, 0.0  ;;  %v376_v48 = vsel %vm334_vm0, %v362_v6, 0.0  ;;  %s790_s7 = scalar_lea.hbm %s789_s6, 4  ;;  %s794_s5 = scalar_lea.hbm %s1081_s3, 8 }
  0x3c   : > { %v341_v46 = vsel %vm340_vm1, %v571_v2, %v335_v44  ;;  %v381_v51 = vsel %vm340_vm1, %v574_v8, %v376_v48  ;;  %vm319_vm4 = vcmp.ge.s32.totalorder %v318_v33, 0  ;;  %p791_p4 = scmp.ne.s32.totalorder %s789_s6, %s790_s7  ;;  %p795_p7 = scmp.lt.s32.totalorder %s789_s6, %s1081_s3 }
  0x3d   : > { %v330_v14 = vsub.f32 %v320_v1, %v329_v11  ;;  %v336_v15 = vsub.f32 %v571_v2, %v329_v11  ;;  %v342_v16 = vsub.f32 %v572_v4, %v329_v11  ;;  %v348_v17 = vsub.f32 %v1012_v5, %v329_v11  ;;  %p796_p8 = scmp.lt.s32.totalorder %s794_s5, %s790_s7 }
  0x3e   : > { %v1022_v18 = vmax.f32 %v368_v13, %v1017_v12  ;;  %v347_v49 = vsel %vm346_vm2, %v572_v4, %v341_v46  ;;  %v386_v55 = vsel %vm346_vm2, %v1014_v9, %v381_v51  ;;  %v358_v58 = vld [vmem:[%s1008_s27] sm:$0x3]  ;;  %p792_p5 = pnand %p791_p4, %p942_p9 }
  0x3f   : > { %v331_v19 = vmul.f32 1.442695, %v330_v14  ;;  %v337_v20 = vmul.f32 1.442695, %v336_v15  ;;  %v343_v21 = vmul.f32 1.442695, %v342_v16  ;;  %v353_v53 = vsel %vm352_vm3, %v1012_v5, %v347_v49  ;;  %p797_p10 = por %p796_p8, %p795_p7 }
  0x40   : > { %v349_v22 = vmul.f32 1.442695, %v348_v17  ;;  %v372_v23 = vsub.f32 %v362_v6, %v1022_v18  ;;  %v377_v24 = vsub.f32 %v574_v8, %v1022_v18  ;;  %v382_v25 = vsub.f32 %v1014_v9, %v1022_v18  ;;  %v577_v1 = vld [vmem:[%s1008_s27 + $0x2] sm:$0x3]  ;;  %p793_p6 = pneg %p792_p5 }
  0x41   : > { %664 = vpow2.f32 %v331_v19  ;;  %v387_v26 = vsub.f32 %v1017_v12, %v1022_v18  ;;  %v391_v60 = vsel %vm352_vm3, %v1017_v12, %v386_v55 }
  0x42   : > { %666 = vpow2.f32 %v337_v20  ;;  %v373_v27 = vmul.f32 1.442695, %v372_v23  ;;  %v378_v28 = vmul.f32 1.442695, %v377_v24  ;;  %v383_v29 = vmul.f32 1.442695, %v382_v25  ;;  %p798_p13 = pnand %p797_p10, %p793_p6 }
  0x43   : > { %668 = vpow2.f32 %v343_v21  ;;  %v388_v30 = vmul.f32 1.442695, %v387_v26 }
  0x44   : > { %670 = vpow2.f32 %v349_v22 }
  0x45   : > { %672 = vpow2.f32 %v373_v27 }
  0x46   : > { %674 = vpow2.f32 %v378_v28 }
  0x47   : > { %v665_v31 = vpop.eup %664  ;;  %676 = vpow2.f32 %v383_v29 }
  0x48   : > { %v667_v32 = vpop.eup %666  ;;  %678 = vpow2.f32 %v388_v30 }
  0x49   : > { %v669_v34 = vpop.eup %668  ;;  %v339_v35 = vadd.f32 %v667_v32, %v665_v31 }
  0x4a   : > { %v671_v36 = vpop.eup %670 }
  0x4b   : > { %v673_v37 = vpop.eup %672  ;;  %v345_v38 = vadd.f32 %v669_v34, %v339_v35 }
  0x4c   : > { %v675_v39 = vpop.eup %674 }
  0x4d   : > { %v677_v40 = vpop.eup %676  ;;  %v351_v41 = vadd.f32 %v671_v36, %v345_v38  ;;  %v380_v42 = vadd.f32 %v675_v39, %v673_v37 }
  0x4e   : > { %v679_v43 = vpop.eup %678 }
  0x4f   : > { %680 = vlog2.f32 %v351_v41  ;;  %v385_v45 = vadd.f32 %v677_v40, %v380_v42 }
  0x51   : > { %v390_v47 = vadd.f32 %v679_v43, %v385_v45 }
  0x53   : > { %682 = vlog2.f32 %v390_v47 }
  0x55   : > { %v681_v50 = vpop.eup %680 }
  0x56   : > { %v355_v52 = vmul.f32 0.6931472, %v681_v50 }
  0x58   : > { %v356_v54 = vadd.f32 %v355_v52, %v329_v11 }
  0x59   : > { %v683_v56 = vpop.eup %682 }
  0x5a   : > { %v357_v57 = vsub.f32 %v356_v54, %v353_v53  ;;  %v393_v59 = vmul.f32 0.6931472, %v683_v56 }
  0x5c   : > { %v359_v61 = vsel %vm319_vm4, %v357_v57, 0.0  ;;  %v394_v62 = vadd.f32 %v393_v59, %v1022_v18 }
  0x5d   : > { %v360_v63 = vadd.f32 %v359_v61, %v358_v58 }
  0x5e   : > { %v395_v0 = vsub.f32 %v394_v62, %v391_v60 }
  0x5f   : > { %361 = vst [vmem:[%s1008_s27] sm:$0x3] %v360_v63 }
  0x60   : > { %v398_v2 = vsel %vm319_vm4, %v395_v0, 0.0 }
  0x61   : > { %v399_v3 = vadd.f32 %v577_v1, %v398_v2 }
  0x63   : > { %578 = vst [vmem:[%s1008_s27 + $0x2] sm:$0x3] %v399_v3 }
  0x64   : > { %801 = shalt.err (!%p798_p13)
}
  0x65   : > { %s865_s1 = smov 32   ;;  %s866_s20 = smov 2  }
  0x66   : > { %593 = dma.vmem_to_hbm [thread:$0]  (%p942_p9), %s416_s21, 64, %s418_s22, %s402_s23, %s865_s1, %s865_s1, %s866_s20  }
  0x67 PF: > { %s1106_s28 = sld [smem:[#allocation12_spill]]  ;;  %p606_p0 = pnand %p557_p12, %p949_p11 }
  0x68   : > { %s1108_s12 = sld [smem:[#allocation14_spill]] }
  0x69   : > { %p607_p1 = pneg %p606_p0 }
  0x6d   : > { %s432_s17 = sand.u32 1, %s1106_s28  }
  0x6e   : > { %s433_s25 = scalar_lea.sflag [#allocation4], %s432_s17 }
  0x6f   : > { %835 = dma.done.wait (%p607_p1), %s433_s25, 64  }
  0x70   : > { %837 = vsyncadd (%p607_p1), %s433_s25, 4294967232  ;;  %s22_s17 = sadd.s32 1, %s1108_s12   ;;  %s1109_s26 = sld [smem:[#allocation13_spill]] }
  0x71   : > { %p19_p2 = scmp.ge.s32.totalorder %s22_s17, 4   ;;  %s1110_s14 = sld [smem:[#allocation17_spill]] }
  0x72   : > { %s1111_s27 = sld [smem:[#allocation15_spill]]  ;;  %s1112_s12 = smov %s844_s13 }
  0x73   : > { %s1114_s15 = smov %s856_s16 }
  0x74   :  { %21 = sbr.rel (!%p19_p2) target bundleno = 10 (0xa), region = 112 }
  0x76   : > { %s1113_s13 = smov %s1109_s26 }
  0x78   : > { %s1115_s16 = smov %s1111_s27 }
  0x79   :  { %439 = vsyncpa [#allocation3], 1 }
  0x7a   :  { %441 = vsyncpa [#allocation3 + $0x1], 1 }
  0x7b   :  { %442 = vsyncpa [#allocation6], 1 }
  0x7c   :  { %444 = vsyncpa [#allocation6 + $0x1], 1 }
  0x7d   :  { %445 = vsyncpa [#allocation4], 1 }
  0x7e   :  { %447 = vsyncpa [#allocation4 + $0x1], 1 }

</bundles_post_ra>
